<compile_context>
chip_gen: v7x
topology: tpu7x:2x2x1
jax: 0.10.0
libtpu: 0.0.40
codegen_flags: <defaults>
</compile_context>

<pallas_src>
import jax
import jax.numpy as jnp
from jax.experimental import pallas as pl
from jax.experimental.pallas import tpu as pltpu


def _round_up(x, m):
    return (x + m - 1) // m * m


def head_kernel(x_ref, w1_ref, b1_ref, w2_ref, b2_ref, out_ref):
    # x_ref : [B_tile, C, HW]   feature maps in native NCHW layout (spatial last)
    # w1_ref: [C, hidden]        b1_ref: [1, hidden]
    # w2_ref: [hidden, NC_pad]   b2_ref: [1, NC_pad]
    # out_ref: [B_tile, NC_pad]  f32 logits (lane-dense, padded class dim)
    hw = x_ref.shape[-1]

    # Global average pool over the spatial (lane) axis, f32 accumulation.
    pooled = jnp.sum(x_ref[...], axis=-1, dtype=jnp.float32) * (1.0 / hw)

    # Linear(num_features, 256) + ReLU  (MXU, f32 accumulate).
    h = jnp.dot(pooled.astype(w1_ref.dtype), w1_ref[...],
                preferred_element_type=jnp.float32)
    h = jnp.maximum(h + b1_ref[...].astype(jnp.float32), 0.0)

    # Dropout(0.2) is the identity at inference time.
    # Linear(256, num_classes) on the padded (lane-dense) class dim.
    o = jnp.dot(h.astype(w2_ref.dtype), w2_ref[...],
                preferred_element_type=jnp.float32)
    o = o + b2_ref[...].astype(jnp.float32)

    out_ref[...] = o.astype(out_ref.dtype)


def custom_model_head(x_nchw, w1, b1, w2, b2, *, b_tile=128,
                      vmem_limit_bytes=None):
    """GAP + Linear(256) + ReLU + Dropout(eval) + Linear(num_classes).

    x_nchw: [B, C, H, W] backbone feature maps (PyTorch NCHW layout).
    w1: [C, hidden], b1: [hidden], w2: [hidden, num_classes], b2: [num_classes]
    (transposed vs. nn.Linear's [out, in] storage).
    b_tile: pooled rows per grid step — size against the generation's scoped
            VMEM (smaller on v5e/v7x, larger on v6e); pass vmem_limit_bytes
            to raise the scoped-VMEM budget when using bigger tiles.
    """
    B, C, H, W = x_nchw.shape
    HW = H * W
    hidden = w1.shape[1]
    num_classes = w2.shape[1]

    # Free reshape (no data movement): NCHW -> [B, C, H*W].
    x = x_nchw.reshape(B, C, HW)

    # Lane-dense class dim: zero-pad to a multiple of 128.
    nc_pad = _round_up(num_classes, 128)
    w2_p = jnp.pad(w2, ((0, 0), (0, nc_pad - num_classes)))
    b2_p = jnp.pad(b2, (0, nc_pad - num_classes)).reshape(1, nc_pad)
    b1_p = b1.reshape(1, hidden)

    # Batch tiling (sublane-aligned); pad B to a whole number of tiles.
    bt = _round_up(min(b_tile, _round_up(B, 8)), 8)
    b_pad = _round_up(B, bt)
    if b_pad != B:
        x = jnp.pad(x, ((0, b_pad - B), (0, 0), (0, 0)))

    grid = (b_pad // bt,)

    cp_kwargs = dict(dimension_semantics=("parallel",))
    if vmem_limit_bytes is not None:
        cp_kwargs["vmem_limit_bytes"] = vmem_limit_bytes

    out = pl.pallas_call(
        head_kernel,
        out_shape=jax.ShapeDtypeStruct((b_pad, nc_pad), jnp.float32),
        grid=grid,
        in_specs=[
            # Feature map: tiled over batch, full C and HW per block.
            pl.BlockSpec((bt, C, HW), lambda i: (i, 0, 0)),
            # Weights/biases: constant index_map -> stay VMEM-resident.
            pl.BlockSpec((C, hidden), lambda i: (0, 0)),
            pl.BlockSpec((1, hidden), lambda i: (0, 0)),
            pl.BlockSpec((hidden, nc_pad), lambda i: (0, 0)),
            pl.BlockSpec((1, nc_pad), lambda i: (0, 0)),
        ],
        out_specs=pl.BlockSpec((bt, nc_pad), lambda i: (i, 0)),
        compiler_params=pltpu.CompilerParams(**cp_kwargs),
    )(x, w1, b1_p, w2_p, b2_p)

    # Strip batch and class padding (tiny [B_pad, 128] slice in the wrapper).
    return out[:B, :num_classes]


def reference(x_nchw, w1, b1, w2, b2):
    pooled = jnp.mean(x_nchw.astype(jnp.float32), axis=(2, 3))  # [B, C]
    h = jnp.maximum(pooled @ w1 + b1, 0.0)
    return h @ w2 + b2


if __name__ == "__main__":
    # Small deterministic shapes consistent with the module:
    # num_features(C)=32, spatial=8x8, hidden=256, num_classes=10.
    C, H, W = 32, 8, 8
    HIDDEN, NUM_CLASSES = 256, 10

    key = jax.random.PRNGKey(0)
    kx, k1, k2, k3, k4 = jax.random.split(key, 5)

    w1 = jax.random.normal(k1, (C, HIDDEN), dtype=jnp.float32) * 0.05
    b1 = jax.random.normal(k2, (HIDDEN,), dtype=jnp.float32) * 0.05
    w2 = jax.random.normal(k3, (HIDDEN, NUM_CLASSES), dtype=jnp.float32) * 0.05
    b2 = jax.random.normal(k4, (NUM_CLASSES,), dtype=jnp.float32) * 0.05

    # --- Check 1: f32, batch=2 (single batch tile) -------------------------
    B = 2
    x = jax.random.normal(kx, (B, C, H, W), dtype=jnp.float32)
    out = jax.block_until_ready(custom_model_head(x, w1, b1, w2, b2))
    ref = reference(x, w1, b1, w2, b2)
    assert out.shape == (B, NUM_CLASSES)
    assert jnp.allclose(out, ref, atol=1e-3, rtol=1e-3), (
        f"f32 mismatch: {jnp.max(jnp.abs(out - ref))}")

    # --- Check 2: bf16 carry, batch=20, b_tile=8 -> multi-tile batch grid ---
    B2 = 20
    x2 = jax.random.normal(jax.random.PRNGKey(1), (B2, C, H, W),
                           dtype=jnp.float32)
    out_bf16 = jax.block_until_ready(
        custom_model_head(x2.astype(jnp.bfloat16),
                          w1.astype(jnp.bfloat16), b1,
                          w2.astype(jnp.bfloat16), b2,
                          b_tile=8))
    ref2 = reference(x2, w1, b1, w2, b2)
    assert out_bf16.shape == (B2, NUM_CLASSES)
    assert jnp.allclose(out_bf16, ref2, atol=3e-2, rtol=3e-2), (
        f"bf16 mismatch: {jnp.max(jnp.abs(out_bf16 - ref2))}")

    print("KERNEL_OK")
</pallas_src>

<mosaic_0001>
module attributes {stable_mosaic.version = 11 : i64} {
  func.func @head_kernel(%arg0: i32, %arg1: memref<8x32x64xf32, #tpu.memory_space<vmem>>, %arg2: memref<32x256xf32, #tpu.memory_space<vmem>>, %arg3: memref<1x256xf32, #tpu.memory_space<vmem>>, %arg4: memref<256x128xf32, #tpu.memory_space<vmem>>, %arg5: memref<1x128xf32, #tpu.memory_space<vmem>>, %arg6: memref<8x128xf32, #tpu.memory_space<vmem>>) attributes {dimension_semantics = [#tpu.dimension_semantics<parallel>], iteration_bounds = array<i64: 1>, scalar_prefetch = 0 : i64, scratch_operands = 0 : i64, tpu.core_type = #tpu.core_type<tc>, window_params = [{transform_indices = @transform_0, window_bounds = array<i64: 8, 32, 64>}, {pipeline_mode = #tpu.pipeline_mode<synchronous>, transform_indices = @transform_1, window_bounds = array<i64: 32, 256>}, {pipeline_mode = #tpu.pipeline_mode<synchronous>, transform_indices = @transform_2, window_bounds = array<i64: 1, 256>}, {pipeline_mode = #tpu.pipeline_mode<synchronous>, transform_indices = @transform_3, window_bounds = array<i64: 256, 128>}, {pipeline_mode = #tpu.pipeline_mode<synchronous>, transform_indices = @transform_4, window_bounds = array<i64: 1, 128>}, {transform_indices = @transform_5, window_bounds = array<i64: 8, 128>}]} {
    %c0 = arith.constant 0 : index
    %c0_0 = arith.constant 0 : index
    %c0_1 = arith.constant 0 : index
    %0 = vector.load %arg1[%c0, %c0_0, %c0_1] : memref<8x32x64xf32, #tpu.memory_space<vmem>>, vector<8x32x64xf32>
    %cst = arith.constant dense<0.000000e+00> : vector<8x32xf32>
    %1 = vector.multi_reduction <add>, %0, %cst [2] : vector<8x32x64xf32> to vector<8x32xf32>
    %cst_2 = arith.constant 1.562500e-02 : f32
    %2 = vector.broadcast %cst_2 : f32 to vector<8x32xf32>
    %3 = arith.mulf %1, %2 : vector<8x32xf32>
    %c0_3 = arith.constant 0 : index
    %c0_4 = arith.constant 0 : index
    %4 = vector.load %arg2[%c0_3, %c0_4] : memref<32x256xf32, #tpu.memory_space<vmem>>, vector<32x256xf32>
    %cst_5 = arith.constant dense<0.000000e+00> : vector<8x256xf32>
    %5 = tpu.matmul %3, %4, %cst_5 {dimension_numbers = #tpu.dot_dimension_numbers<[1], [0], [0], [1], [0, 0, 1, 1], [], []>} : vector<8x32xf32>, vector<32x256xf32>, vector<8x256xf32> -> vector<8x256xf32>
    %c0_6 = arith.constant 0 : index
    %c0_7 = arith.constant 0 : index
    %6 = vector.load %arg3[%c0_6, %c0_7] : memref<1x256xf32, #tpu.memory_space<vmem>>, vector<1x256xf32>
    %7 = vector.broadcast %6 : vector<1x256xf32> to vector<8x256xf32>
    %8 = arith.addf %5, %7 : vector<8x256xf32>
    %cst_8 = arith.constant 0.000000e+00 : f32
    %9 = vector.broadcast %cst_8 : f32 to vector<8x256xf32>
    %10 = arith.maximumf %8, %9 : vector<8x256xf32>
    %c0_9 = arith.constant 0 : index
    %c0_10 = arith.constant 0 : index
    %11 = vector.load %arg4[%c0_9, %c0_10] : memref<256x128xf32, #tpu.memory_space<vmem>>, vector<256x128xf32>
    %cst_11 = arith.constant dense<0.000000e+00> : vector<8x128xf32>
    %12 = tpu.matmul %10, %11, %cst_11 {dimension_numbers = #tpu.dot_dimension_numbers<[1], [0], [0], [1], [0, 0, 1, 1], [], []>} : vector<8x256xf32>, vector<256x128xf32>, vector<8x128xf32> -> vector<8x128xf32>
    %c0_12 = arith.constant 0 : index
    %c0_13 = arith.constant 0 : index
    %13 = vector.load %arg5[%c0_12, %c0_13] : memref<1x128xf32, #tpu.memory_space<vmem>>, vector<1x128xf32>
    %14 = vector.broadcast %13 : vector<1x128xf32> to vector<8x128xf32>
    %15 = arith.addf %12, %14 : vector<8x128xf32>
    %c0_14 = arith.constant 0 : index
    %c0_15 = arith.constant 0 : index
    %16 = vector.load %arg6[%c0_14, %c0_15] : memref<8x128xf32, #tpu.memory_space<vmem>>, vector<8x128xf32>
    tpu.vector_store %arg6[%c0_14, %c0_15], %15 {strides = array<i32>} : memref<8x128xf32, #tpu.memory_space<vmem>>, vector<8x128xf32>,
    return
  }
  func.func @transform_0(%arg0: i32) -> (i32, i32, i32) {
    %c0_i32 = arith.constant 0 : i32
    %c0_i32_0 = arith.constant 0 : i32
    %c0_i32_1 = arith.constant 0 : i32
    return %arg0, %c0_i32, %c0_i32_0 : i32, i32, i32
  }
  func.func @transform_1(%arg0: i32) -> (i32, i32) {
    %c0_i32 = arith.constant 0 : i32
    %c0_i32_0 = arith.constant 0 : i32
    %c0_i32_1 = arith.constant 0 : i32
    return %c0_i32, %c0_i32_0 : i32, i32
  }
  func.func @transform_2(%arg0: i32) -> (i32, i32) {
    %c0_i32 = arith.constant 0 : i32
    %c0_i32_0 = arith.constant 0 : i32
    %c0_i32_1 = arith.constant 0 : i32
    return %c0_i32, %c0_i32_0 : i32, i32
  }
  func.func @transform_3(%arg0: i32) -> (i32, i32) {
    %c0_i32 = arith.constant 0 : i32
    %c0_i32_0 = arith.constant 0 : i32
    %c0_i32_1 = arith.constant 0 : i32
    return %c0_i32, %c0_i32_0 : i32, i32
  }
  func.func @transform_4(%arg0: i32) -> (i32, i32) {
    %c0_i32 = arith.constant 0 : i32
    %c0_i32_0 = arith.constant 0 : i32
    %c0_i32_1 = arith.constant 0 : i32
    return %c0_i32, %c0_i32_0 : i32, i32
  }
  func.func @transform_5(%arg0: i32) -> (i32, i32) {
    %c0_i32 = arith.constant 0 : i32
    %c0_i32_0 = arith.constant 0 : i32
    return %arg0, %c0_i32 : i32, i32
  }
}

</mosaic_0001>

<bundles_post_ra>
// kernel: tpu_custom_call.1
= control target key start
LH: loop header
LB: loop body
LE: loop exit
PB: predicated region body
PF: predicated region fallthrough
CT: control target
= control target key end

     0   :  { %10 = vsyncpa [#allocation3], 0  ;;  %s1040_s0 = inlined_call_operand.hbm [shape: f32[8,32,64], index: 0, kind: input, shape index: {}]   ;;  %s1041_s1 = inlined_call_operand.hbm [shape: f32[32,256], index: 1, kind: input, shape index: {}]   ;;  %s1042_s2 = inlined_call_operand.vmem [shape: f32[1,256], index: 2, kind: input, shape index: {}]   ;;  %s1043_s3 = inlined_call_operand.hbm [shape: f32[256,128], index: 3, kind: input, shape index: {}]   ;;  %s1044_s4 = inlined_call_operand.vmem [shape: f32[1,128], index: 4, kind: input, shape index: {}]   ;;  %s1045_s5 = inlined_call_operand.hbm [shape: f32[8,128], index: 5, kind: output, shape index: {}]  }
   0x1   :  { %11 = vsyncpa [#allocation6], 0 }
   0x2   :  { %12 = vsyncpa [#allocation4], 0  ;;  %s831_s18 = smov [#allocation5]   ;;  %s737_s22 = scalar_lea.hbm %s1041_s1, 1024 }
   0x3   :  { %s30_s19 = sshll.u32 %s831_s18, 4  ;;  %p738_p0 = scmp.ne.s32.totalorder %s1041_s1, %s737_s22  ;;  %s31_s19 = int_to_ptr.vmem [resolvable:$true] %s30_s19 }
   0x4   :  { %p741_p1 = scmp.lt.u32.totalorder %s737_s22, %s1041_s1 }
   0x6   :  { %p743_p2 = pnand %p741_p1, %p738_p0 }
   0x8   :  { %746 = shalt.err (!%p743_p2)
}
   0x9   :  { %s747_s27 = scalar_lea.vmem %s31_s19, 1024  ;;  %p752_p4 = scmp.lt.s32.totalorder %s31_s19, %s31_s19 }
   0xa   :  { %p748_p3 = scmp.ne.s32.totalorder %s31_s19, %s747_s27  ;;  %p753_p5 = scmp.lt.s32.totalorder %s747_s27, %s747_s27 }
   0xc   :  { %p754_p6 = por %p753_p5, %p752_p4 }
   0xe   :  { %p755_p7 = pnand %p754_p6, %p748_p3 }
  0x10   :  { %758 = shalt.err (!%p755_p7)
}
  0x11   :  { %s832_s28 = smov 256   ;;  %s833_s29 = smov 16  }
  0x12   :  { %36 = dma.hbm_to_vmem [thread:$0]  %s1041_s1, 1024, %s31_s19, [#allocation6], %s832_s28, %s832_s28, %s833_s29  }
  0x13   :  { %s834_s7 = smov [#allocation2]   ;;  %s759_s11 = scalar_lea.hbm %s1040_s0, 4096 }
  0x14   :  { %s18_s8 = sshll.u32 %s834_s7, 4  ;;  %p760_p8 = scmp.ne.s32.totalorder %s1040_s0, %s759_s11  ;;  %s19_s8 = int_to_ptr.vmem [resolvable:$true] %s18_s8 }
  0x15   :  { %p763_p9 = scmp.lt.u32.totalorder %s759_s11, %s1040_s0 }
  0x17   :  { %p765_p10 = pnand %p763_p9, %p760_p8 }
  0x19   :  { %768 = shalt.err (!%p765_p10)
}
  0x1a   :  { %s769_s16 = scalar_lea.vmem %s19_s8, 4096  ;;  %p774_p12 = scmp.lt.s32.totalorder %s19_s8, %s19_s8 }
  0x1b   :  { %p770_p11 = scmp.ne.s32.totalorder %s19_s8, %s769_s16  ;;  %p775_p13 = scmp.lt.s32.totalorder %s769_s16, %s769_s16 }
  0x1d   :  { %p776_p0 = por %p775_p13, %p774_p12 }
  0x1f   :  { %p777_p1 = pnand %p776_p0, %p770_p11 }
  0x21   :  { %780 = shalt.err (!%p777_p1)
}
  0x22   :  { %s835_s1 = smov 128   ;;  %s836_s17 = smov 8  }
  0x23   :  { %24 = dma.hbm_to_vmem [thread:$0]  %s1040_s0, 4096, %s19_s8, [#allocation3], %s835_s1, %s835_s1, %s836_s17  }
  0x24   :  { %s837_s20 = smov [#allocation7]   ;;  %s781_s24 = scalar_lea.hbm %s1043_s3, 4096 }
  0x25   :  { %s44_s21 = sshll.u32 %s837_s20, 4  ;;  %p782_p2 = scmp.ne.s32.totalorder %s1043_s3, %s781_s24  ;;  %s45_s21 = int_to_ptr.vmem [resolvable:$true] %s44_s21 }
  0x26   :  { %p785_p3 = scmp.lt.u32.totalorder %s781_s24, %s1043_s3 }
  0x28   :  { %p787_p4 = pnand %p785_p3, %p782_p2 }
  0x2a   :  { %790 = shalt.err (!%p787_p4)
}
  0x2b   :  { %s791_s29 = scalar_lea.vmem %s45_s21, 4096  ;;  %p796_p6 = scmp.lt.s32.totalorder %s45_s21, %s45_s21 }
  0x2c   :  { %p792_p5 = scmp.ne.s32.totalorder %s45_s21, %s791_s29  ;;  %p797_p7 = scmp.lt.s32.totalorder %s791_s29, %s791_s29 }
  0x2e   :  { %p798_p8 = por %p797_p7, %p796_p6 }
  0x30   :  { %p799_p9 = pnand %p798_p8, %p792_p5 }
  0x32   :  { %802 = shalt.err (!%p799_p9)
}
  0x33   :  { %50 = dma.hbm_to_vmem [thread:$0]  %s1043_s3, 4096, %s45_s21, [#allocation6], %s835_s1, %s835_s1, %s836_s17  }
  0x34   :  { %825 = dma.done.wait [#allocation3], 4096  }
  0x35   :  { %826 = vsyncadd [#allocation3], 4294963200 }
  0x36   :  { %827 = dma.done.wait [#allocation6], 5120  }
  0x37   :  { %828 = vsyncadd [#allocation6], 4294962176  ;;  %vm94_vm0 = vcmask 523264   ;;  %v66_v0 = vld [vmem:[#allocation2 + $0x20] sm:$0xff]  ;;  %v67_v2 = vld [vmem:[#allocation2 + $0x28] sm:$0xff]  ;;  %vm286_vm1 = vcmask 130112  }
  0x38   :  { %v62_v1 = vld [vmem:[#allocation2] sm:$0xff]  ;;  %v107_v3 = vsel %vm94_vm0, %v66_v0, 0.0  ;;  %v63_v5 = vld [vmem:[#allocation2 + $0x8] sm:$0xff]  ;;  %v110_v6 = vsel %vm94_vm0, %v67_v2, 0.0  ;;  %v68_v8 = vld [vmem:[#allocation2 + $0x30] sm:$0xff]  ;;  %vm293_vm2 = vcmask 195712  }
  0x39   :  { %v95_v4 = vsel %vm94_vm0, %v62_v1, 0.0  ;;  %108 = vadd.xlane.f32.xlu1 %v107_v3  ;;  %v98_v7 = vsel %vm94_vm0, %v63_v5, 0.0  ;;  %v64_v9 = vld [vmem:[#allocation2 + $0x10] sm:$0xff]  ;;  %v113_v10 = vsel %vm94_vm0, %v68_v8, 0.0  ;;  %v71_v12 = vld [vmem:[#allocation2 + $0x48] sm:$0xff]  ;;  %v70_v13 = vld [vmem:[#allocation2 + $0x40] sm:$0xff] }
  0x3a   :  { %96 = vadd.xlane.f32.xlu0 %v95_v4  ;;  %v101_v11 = vsel %vm94_vm0, %v64_v9, 0.0  ;;  %v122_v14 = vsel %vm94_vm0, %v71_v12, 0.0  ;;  %v119_v15 = vsel %vm94_vm0, %v70_v13, 0.0  ;;  %v69_v16 = vld [vmem:[#allocation2 + $0x38] sm:$0xff]  ;;  %v74_v20 = vld [vmem:[#allocation2 + $0x60] sm:$0xff]  ;;  %v72_v21 = vld [vmem:[#allocation2 + $0x50] sm:$0xff] }
  0x3b   :  { %v65_v17 = vld [vmem:[#allocation2 + $0x18] sm:$0xff]  ;;  %v116_v18 = vsel %vm94_vm0, %v69_v16, 0.0  ;;  %v131_v22 = vsel %vm94_vm0, %v74_v20, 0.0  ;;  %v125_v23 = vsel %vm94_vm0, %v72_v21, 0.0  ;;  %v75_v25 = vld [vmem:[#allocation2 + $0x68] sm:$0xff]  ;;  %v78_v28 = vld [vmem:[#allocation2 + $0x80] sm:$0xff] }
  0x3c   :  { %v104_v19 = vsel %vm94_vm0, %v65_v17, 0.0  ;;  %v73_v24 = vld [vmem:[#allocation2 + $0x58] sm:$0xff]  ;;  %v134_v27 = vsel %vm94_vm0, %v75_v25, 0.0  ;;  %v76_v29 = vld [vmem:[#allocation2 + $0x70] sm:$0xff]  ;;  %v143_v30 = vsel %vm94_vm0, %v78_v28, 0.0  ;;  %v79_v33 = vld [vmem:[#allocation2 + $0x88] sm:$0xff] }
  0x3d   :  { %111 = vadd.xlane.f32.xlu1 %v110_v6  ;;  %v128_v26 = vsel %vm94_vm0, %v73_v24, 0.0  ;;  %v137_v31 = vsel %vm94_vm0, %v76_v29, 0.0  ;;  %v77_v32 = vld [vmem:[#allocation2 + $0x78] sm:$0xff]  ;;  %v146_v35 = vsel %vm94_vm0, %v79_v33, 0.0  ;;  %v82_v36 = vld [vmem:[#allocation2 + $0xa0] sm:$0xff]  ;;  %v80_v37 = vld [vmem:[#allocation2 + $0x90] sm:$0xff] }
  0x3e   :  { %99 = vadd.xlane.f32.xlu0 %v98_v7  ;;  %v140_v34 = vsel %vm94_vm0, %v77_v32, 0.0  ;;  %v155_v38 = vsel %vm94_vm0, %v82_v36, 0.0  ;;  %v149_v39 = vsel %vm94_vm0, %v80_v37, 0.0  ;;  %v81_v40 = vld [vmem:[#allocation2 + $0x98] sm:$0xff]  ;;  %v83_v41 = vld [vmem:[#allocation2 + $0xa8] sm:$0xff]  ;;  %v86_v44 = vld [vmem:[#allocation2 + $0xc0] sm:$0xff] }
  0x3f   :  { %v152_v42 = vsel %vm94_vm0, %v81_v40, 0.0  ;;  %v158_v43 = vsel %vm94_vm0, %v83_v41, 0.0  ;;  %v84_v45 = vld [vmem:[#allocation2 + $0xb0] sm:$0xff]  ;;  %v167_v46 = vsel %vm94_vm0, %v86_v44, 0.0  ;;  %v85_v48 = vld [vmem:[#allocation2 + $0xb8] sm:$0xff]  ;;  %v87_v49 = vld [vmem:[#allocation2 + $0xc8] sm:$0xff] }
  0x40   :  { %v161_v47 = vsel %vm94_vm0, %v84_v45, 0.0  ;;  %v164_v50 = vsel %vm94_vm0, %v85_v48, 0.0  ;;  %v170_v51 = vsel %vm94_vm0, %v87_v49, 0.0  ;;  %v90_v52 = vld [vmem:[#allocation2 + $0xe0] sm:$0xff]  ;;  %v88_v53 = vld [vmem:[#allocation2 + $0xd0] sm:$0xff]  ;;  %v89_v56 = vld [vmem:[#allocation2 + $0xd8] sm:$0xff] }
  0x41   :  { %114 = vadd.xlane.f32.xlu1 %v113_v10  ;;  %v179_v54 = vsel %vm94_vm0, %v90_v52, 0.0  ;;  %v173_v55 = vsel %vm94_vm0, %v88_v53, 0.0  ;;  %v91_v57 = vld [vmem:[#allocation2 + $0xe8] sm:$0xff]  ;;  %v176_v58 = vsel %vm94_vm0, %v89_v56, 0.0  ;;  %v92_v60 = vld [vmem:[#allocation2 + $0xf0] sm:$0xff]  ;;  %v93_v61 = vld [vmem:[#allocation2 + $0xf8] sm:$0xff] }
  0x42   :  { %102 = vadd.xlane.f32.xlu0 %v101_v11  ;;  %v182_v59 = vsel %vm94_vm0, %v91_v57, 0.0  ;;  %v185_v62 = vsel %vm94_vm0, %v92_v60, 0.0  ;;  %v188_v63 = vsel %vm94_vm0, %v93_v61, 0.0  ;;  %v224_v0 = vld [vmem:[#allocation5 + $0x8] sm:$0xff]  ;;  %v226_v1 = vld [vmem:[#allocation5 + $0x18] sm:$0xff]  ;;  %v223_v3 = vld [vmem:[#allocation5] sm:$0xff] }
  0x43   :  { %v688_v2 = vpack.c.bf16 %v226_v1, %v224_v0  ;;  %v225_v4 = vld [vmem:[#allocation5 + $0x10] sm:$0xff]  ;;  %v228_v6 = vld [vmem:[#allocation5 + $0x28] sm:$0xff]  ;;  %v230_v7 = vld [vmem:[#allocation5 + $0x38] sm:$0xff]  ;;  %v838_v12 = vmov 0.0   ;;  %vm300_vm3 = vcmask 261312   ;;  %vm435_vm4 = vcmask 1041409  }
  0x44   :  { %v690_v5 = vpack.c.bf16 %v225_v4, %v223_v3  ;;  %v692_v8 = vpack.c.bf16 %v230_v7, %v228_v6  ;;  %v227_v9 = vld [vmem:[#allocation5 + $0x20] sm:$0xff]  ;;  %v229_v10 = vld [vmem:[#allocation5 + $0x30] sm:$0xff]  ;;  %516 = vmatprep.mubr.f32.mxu0 %v838_v12  ;;  %v526_v17 = vld [vmem:[#allocation7 + $0x8] sm:$0xff]  ;;  %vm437_vm5 = vcmask 1042434   ;;  %vm439_vm6 = vcmask 1043459   ;;  %s839_s9 = smov [#allocation8]  }
  0x45   :  { %123 = vadd.xlane.f32.xlu1 %v122_v14  ;;  %689 = vmatprep.subr.bf16.mxu0 %v688_v2  ;;  %v694_v11 = vpack.c.bf16 %v229_v10, %v227_v9  ;;  %v541_v13 = vld [vmem:[#allocation7 + $0x80] sm:$0xff]  ;;  %v542_v14 = vld [vmem:[#allocation7 + $0x88] sm:$0xff]  ;;  %v233_v2 = vlaneseq  ;;  %vm441_vm7 = vcmask 1044484   ;;  %vm443_vm8 = vcmask 1045509  }
  0x46   :  { %120 = vadd.xlane.f32.xlu0 %v119_v15  ;;  %691 = vmatpush1.bf16.msra.mxu0 %v690_v5  ;;  %v525_v15 = vld [vmem:[#allocation7] sm:$0xff]  ;;  %v696_v16 = vpack.c.bf16 %v542_v14, %v541_v13  ;;  %v546_v25 = vld [vmem:[#allocation7 + $0xa8] sm:$0xff]  ;;  %vm445_vm9 = vcmask 1046534   ;;  %vm447_vm10 = vcmask 1047559   ;;  %vm449_vm11 = vcmask 261120  }
  0x47   :  { %693 = vmatprep.subr.bf16.mxu0 %v692_v8  ;;  %v698_v20 = vpack.c.bf16 %v526_v17, %v525_v15  ;;  %v545_v24 = vld [vmem:[#allocation7 + $0xa0] sm:$0xff]  ;;  %v530_v29 = vld [vmem:[#allocation7 + $0x28] sm:$0xff]  ;;  %v276_v5 = vand.u32 127, %v233_v2  ;;  %v940_v6 = vshrl.u32 %v233_v2, 7 }
  0x48   :  { %697 = vmatprep.subr.bf16.mxu1 %v696_v16  ;;  %v529_v28 = vld [vmem:[#allocation7 + $0x20] sm:$0xff]  ;;  %v550_v37 = vld [vmem:[#allocation7 + $0xc8] sm:$0xff] }
  0x49   :  { %117 = vadd.xlane.f32.xlu1 %v116_v18  ;;  %v543_v18 = vld [vmem:[#allocation7 + $0x90] sm:$0xff]  ;;  %699 = vmatpush3.bf16.msra.mxu1 %v698_v20  ;;  %v706_v32 = vpack.c.bf16 %v530_v29, %v529_v28  ;;  %v549_v36 = vld [vmem:[#allocation7 + $0xc0] sm:$0xff]  ;;  %v534_v41 = vld [vmem:[#allocation7 + $0x48] sm:$0xff]  ;;  %v281_v9 = vadd.s32 4294967288, %v276_v5  ;;  %v288_v10 = vadd.s32 4294967280, %v276_v5  ;;  %v943_v12 = vsub.s32 %v276_v5, %v940_v6 }
  0x4a   :  { %105 = vadd.xlane.f32.xlu0 %v104_v19  ;;  %695 = vmatpush1.bf16.msra.mxu0 %v694_v11  ;;  %v544_v19 = vld [vmem:[#allocation7 + $0x98] sm:$0xff]  ;;  %v533_v40 = vld [vmem:[#allocation7 + $0x40] sm:$0xff]  ;;  %v554_v49 = vld [vmem:[#allocation7 + $0xe8] sm:$0xff]  ;;  %v295_v11 = vadd.s32 4294967272, %v276_v5 }
  0x4b   :  { %v700_v21 = vpack.c.bf16 %v544_v19, %v543_v18  ;;  %v714_v44 = vpack.c.bf16 %v534_v41, %v533_v40  ;;  %v553_v48 = vld [vmem:[#allocation7 + $0xe0] sm:$0xff]  ;;  %v948_v16 = vsub.s32 %v281_v9, %v940_v6  ;;  %v951_v19 = vsub.s32 %v288_v10, %v940_v6 }
  0x4d   :  { %132 = vadd.xlane.f32.xlu1 %v131_v22  ;;  %v527_v22 = vld [vmem:[#allocation7 + $0x10] sm:$0xff]  ;;  %701 = vmatprep.subr.bf16.mxu1 %v700_v21 }
  0x4e   :  { %126 = vadd.xlane.f32.xlu0 %v125_v23  ;;  %v528_v23 = vld [vmem:[#allocation7 + $0x18] sm:$0xff] }
  0x51   :  { %129 = vadd.xlane.f32.xlu1 %v128_v26  ;;  %v702_v26 = vpack.c.bf16 %v528_v23, %v527_v22  ;;  %v954_v23 = vsub.s32 %v295_v11, %v940_v6 }
  0x52   :  { %135 = vadd.xlane.f32.xlu0 %v134_v27  ;;  %v704_v27 = vpack.c.bf16 %v546_v25, %v545_v24 }
  0x53   :  { %703 = vmatpush3.bf16.msra.mxu1 %v702_v26 }
  0x54   :  { %705 = vmatprep.subr.bf16.mxu1 %v704_v27 }
  0x55   :  { %144 = vadd.xlane.f32.xlu1 %v143_v30  ;;  %v547_v30 = vld [vmem:[#allocation7 + $0xb0] sm:$0xff] }
  0x56   :  { %138 = vadd.xlane.f32.xlu0 %v137_v31  ;;  %v548_v31 = vld [vmem:[#allocation7 + $0xb8] sm:$0xff] }
  0x57   :  { %v708_v33 = vpack.c.bf16 %v548_v31, %v547_v30  ;;  %707 = vmatpush3.bf16.msra.mxu1 %v706_v32 }
  0x59   :  { %141 = vadd.xlane.f32.xlu1 %v140_v34  ;;  %v531_v34 = vld [vmem:[#allocation7 + $0x30] sm:$0xff]  ;;  %709 = vmatprep.subr.bf16.mxu1 %v708_v33 }
  0x5a   :  { %147 = vadd.xlane.f32.xlu0 %v146_v35  ;;  %v532_v35 = vld [vmem:[#allocation7 + $0x38] sm:$0xff] }
  0x5d   :  { %156 = vadd.xlane.f32.xlu1 %v155_v38  ;;  %v710_v38 = vpack.c.bf16 %v532_v35, %v531_v34 }
  0x5e   :  { %150 = vadd.xlane.f32.xlu0 %v149_v39  ;;  %v712_v39 = vpack.c.bf16 %v550_v37, %v549_v36 }
  0x5f   :  { %711 = vmatpush3.bf16.msra.mxu1 %v710_v38 }
  0x60   :  { %713 = vmatprep.subr.bf16.mxu1 %v712_v39 }
  0x61   :  { %153 = vadd.xlane.f32.xlu1 %v152_v42  ;;  %v551_v42 = vld [vmem:[#allocation7 + $0xd0] sm:$0xff] }
  0x62   :  { %159 = vadd.xlane.f32.xlu0 %v158_v43  ;;  %v552_v43 = vld [vmem:[#allocation7 + $0xd8] sm:$0xff] }
  0x63   :  { %v716_v45 = vpack.c.bf16 %v552_v43, %v551_v42  ;;  %715 = vmatpush3.bf16.msra.mxu1 %v714_v44 }
  0x65   :  { %168 = vadd.xlane.f32.xlu1 %v167_v46  ;;  %v535_v46 = vld [vmem:[#allocation7 + $0x50] sm:$0xff]  ;;  %717 = vmatprep.subr.bf16.mxu1 %v716_v45 }
  0x66   :  { %162 = vadd.xlane.f32.xlu0 %v161_v47  ;;  %v536_v47 = vld [vmem:[#allocation7 + $0x58] sm:$0xff] }
  0x69   :  { %165 = vadd.xlane.f32.xlu1 %v164_v50  ;;  %v718_v50 = vpack.c.bf16 %v536_v47, %v535_v46 }
  0x6a   :  { %171 = vadd.xlane.f32.xlu0 %v170_v51  ;;  %v720_v51 = vpack.c.bf16 %v554_v49, %v553_v48 }
  0x6b   :  { %719 = vmatpush3.bf16.msra.mxu1 %v718_v50 }
  0x6c   :  { %721 = vmatprep.subr.bf16.mxu1 %v720_v51 }
  0x6d   :  { %180 = vadd.xlane.f32.xlu1 %v179_v54 }
  0x6e   :  { %174 = vadd.xlane.f32.xlu0 %v173_v55 }
  0x71   :  { %177 = vadd.xlane.f32.xlu1 %v176_v58 }
  0x72   :  { %183 = vadd.xlane.f32.xlu0 %v182_v59 }
  0x75   :  { %189 = vadd.xlane.f32.xlu1 %v188_v63 }
  0x76   :  { %186 = vadd.xlane.f32.xlu0 %v185_v62 }
  0xc6   :  { %v109_v52 = vpop.xlane.xlu1 %108 }
  0xc7   :  { %v97_v53 = vpop.xlane.xlu0 %96  ;;  %v195_v15 = vmul.f32 0.015625, %v109_v52 }
  0xc8   :  { %v191_v22 = vmul.f32 0.015625, %v97_v53 }
  0xc9   :  { %v305_v28 = vrot.slane %v195_v15, %v943_v12 }
  0xca   :  { %v112_v54 = vpop.xlane.xlu1 %111  ;;  %v280_v35 = vrot.slane %v191_v22, %v943_v12 }
  0xcb   :  { %v100_v55 = vpop.xlane.xlu0 %99  ;;  %v196_v17 = vmul.f32 0.015625, %v112_v54 }
  0xcc   :  { %v192_v18 = vmul.f32 0.015625, %v100_v55 }
  0xcd   :  { %v309_v29 = vrot.slane %v196_v17, %v948_v16 }
  0xce   :  { %v115_v56 = vpop.xlane.xlu1 %114  ;;  %v285_v30 = vrot.slane %v192_v18, %v948_v16 }
  0xcf   :  { %v103_v57 = vpop.xlane.xlu0 %102  ;;  %v197_v20 = vmul.f32 0.015625, %v115_v56  ;;  %v310_v41 = vsel %vm286_vm1, %v309_v29, %v305_v28 }
  0xd0   :  { %v193_v21 = vmul.f32 0.015625, %v103_v57  ;;  %v287_v42 = vsel %vm286_vm1, %v285_v30, %v280_v35 }
  0xd1   :  { %v314_v31 = vrot.slane %v197_v20, %v951_v19 }
  0xd2   :  { %v124_v58 = vpop.xlane.xlu1 %123  ;;  %v292_v32 = vrot.slane %v193_v21, %v951_v19 }
  0xd3   :  { %v121_v59 = vpop.xlane.xlu0 %120  ;;  %v200_v33 = vmul.f32 0.015625, %v124_v58  ;;  %v315_v44 = vsel %vm293_vm2, %v314_v31, %v310_v41 }
  0xd4   :  { %v199_v34 = vmul.f32 0.015625, %v121_v59  ;;  %v294_v45 = vsel %vm293_vm2, %v292_v32, %v287_v42 }
  0xd5   :  { %v328_v46 = vrot.slane %v200_v33, %v948_v16 }
  0xd6   :  { %v118_v60 = vpop.xlane.xlu1 %117  ;;  %v324_v47 = vrot.slane %v199_v34, %v943_v12 }
  0xd7   :  { %v106_v61 = vpop.xlane.xlu0 %105  ;;  %v198_v24 = vmul.f32 0.015625, %v118_v60 }
  0xd8   :  { %v194_v25 = vmul.f32 0.015625, %v106_v61  ;;  %v329_v57 = vsel %vm286_vm1, %v328_v46, %v324_v47 }
  0xd9   :  { %v319_v36 = vrot.slane %v198_v24, %v954_v23 }
  0xda   :  { %v133_v62 = vpop.xlane.xlu1 %132  ;;  %v299_v37 = vrot.slane %v194_v25, %v954_v23 }
  0xdb   :  { %v127_v63 = vpop.xlane.xlu0 %126  ;;  %v320_v48 = vsel %vm300_vm3, %v319_v36, %v315_v44  ;;  %v203_v55 = vmul.f32 0.015625, %v133_v62 }
  0xdc   :  { %v201_v38 = vmul.f32 0.015625, %v127_v63  ;;  %v301_v49 = vsel %vm300_vm3, %v299_v37, %v294_v45 }
  0xdd   :  { %v436_v58 = vsel %vm435_vm4, %v320_v48, %v301_v49  ;;  %v343_v10 = vrot.slane %v203_v55, %v943_v12 }
  0xde   :  { %v130_v0 = vpop.xlane.xlu1 %129  ;;  %v333_v50 = vrot.slane %v201_v38, %v951_v19 }
  0xdf   :  { %v136_v1 = vpop.xlane.xlu0 %135  ;;  %v202_v43 = vmul.f32 0.015625, %v130_v0 }
  0xe0   :  { %v204_v51 = vmul.f32 0.015625, %v136_v1  ;;  %v334_v60 = vsel %vm293_vm2, %v333_v50, %v329_v57 }
  0xe1   :  { %v338_v56 = vrot.slane %v202_v43, %v954_v23 }
  0xe2   :  { %v145_v3 = vpop.xlane.xlu1 %144  ;;  %v347_v61 = vrot.slane %v204_v51, %v948_v16 }
  0xe3   :  { %v938_v4 = vpop.xlane.xlu0 %138  ;;  %v207_v59 = vmul.f32 0.015625, %v145_v3  ;;  %v339_v3 = vsel %vm300_vm3, %v338_v56, %v334_v60 }
  0xe4   :  { %v205_v63 = vmul.f32 0.015625, %v938_v4  ;;  %v438_v51 = vsel %vm437_vm5, %v339_v3, %v436_v58  ;;  %v235_v3 = vsub.s32 0, %v940_v6 }
  0xe5   :  { %v362_v17 = vrot.slane %v207_v59, %v943_v12 }
  0xe6   :  { %v142_v7 = vpop.xlane.xlu1 %141  ;;  %v352_v20 = vrot.slane %v205_v63, %v951_v19 }
  0xe7   :  { %v148_v8 = vpop.xlane.xlu0 %147  ;;  %v206_v1 = vmul.f32 0.015625, %v142_v7  ;;  %v348_v7 = vsel %vm286_vm1, %v347_v61, %v343_v10 }
  0xe8   :  { %v208_v52 = vmul.f32 0.015625, %v148_v8  ;;  %v353_v37 = vsel %vm293_vm2, %v352_v20, %v348_v7 }
  0xe9   :  { %v357_v24 = vrot.slane %v206_v1, %v954_v23  ;;  %v537_v1 = vld [vmem:[#allocation7 + $0x60] sm:$0xff] }
  0xea   :  { %v945_v13 = vpop.xlane.xlu1 %156  ;;  %v366_v2 = vrot.slane %v208_v52, %v948_v16 }
  0xeb   :  { %v151_v14 = vpop.xlane.xlu0 %150  ;;  %v211_v4 = vmul.f32 0.015625, %v945_v13  ;;  %v358_v41 = vsel %vm300_vm3, %v357_v24, %v353_v37 }
  0xec   :  { %v209_v0 = vmul.f32 0.015625, %v151_v14  ;;  %v367_v25 = vsel %vm286_vm1, %v366_v2, %v362_v17  ;;  %v440_v55 = vsel %vm439_vm6, %v358_v41, %v438_v51 }
  0xed   :  { %v381_v33 = vrot.slane %v211_v4, %v943_v12 }
  0xee   :  { %v154_v26 = vpop.xlane.xlu1 %153  ;;  %v371_v21 = vrot.slane %v209_v0, %v951_v19 }
  0xef   :  { %v160_v27 = vpop.xlane.xlu0 %159  ;;  %v210_v62 = vmul.f32 0.015625, %v154_v26 }
  0xf0   :  { %v212_v5 = vmul.f32 0.015625, %v160_v27  ;;  %v372_v38 = vsel %vm293_vm2, %v371_v21, %v367_v25  ;;  %v652_v25 = vld [vmem:[%s1044_s4] ss:$0 sm:$0xff] }
  0xf1   :  { %v376_v26 = vrot.slane %v210_v62, %v954_v23  ;;  %v556_v62 = vld [vmem:[#allocation7 + $0xf8] sm:$0xff] }
  0xf2   :  { %v169_v39 = vpop.xlane.xlu1 %168  ;;  %v385_v27 = vrot.slane %v212_v5, %v948_v16 }
  0xf3   :  { %v163_v40 = vpop.xlane.xlu0 %162  ;;  %v215_v22 = vmul.f32 0.015625, %v169_v39  ;;  %v377_v42 = vsel %vm300_vm3, %v376_v26, %v372_v38 }
  0xf4   :  { %v213_v11 = vmul.f32 0.015625, %v163_v40  ;;  %v386_v43 = vsel %vm286_vm1, %v385_v27, %v381_v33  ;;  %v442_v59 = vsel %vm441_vm7, %v377_v42, %v440_v55 }
  0xf5   :  { %v400_v39 = vrot.slane %v215_v22, %v943_v12 }
  0xf6   :  { %v166_v53 = vpop.xlane.xlu1 %165  ;;  %v390_v29 = vrot.slane %v213_v11, %v951_v19  ;;  %v231_v11 = vld [vmem:[%s1042_s2] sm:$0x3]  ;;  %s641_s2 = sshll.u32 %s839_s9, 4  ;;  %s642_s2 = int_to_ptr.vmem [resolvable:$true] %s641_s2 }
  0xf7   :  { %v172_v54 = vpop.xlane.xlu0 %171  ;;  %v214_v14 = vmul.f32 0.015625, %v166_v53  ;;  %v236_v17 = vrot.slane %v231_v11, %v235_v3  ;;  %s803_s10 = scalar_lea.vmem %s642_s2, 128  ;;  %p808_p11 = scmp.lt.s32.totalorder %s642_s2, %s642_s2 }
  0xf8   :  { %v216_v15 = vmul.f32 0.015625, %v172_v54  ;;  %v391_v47 = vsel %vm293_vm2, %v390_v29, %v386_v43  ;;  %p804_p10 = scmp.ne.s32.totalorder %s642_s2, %s803_s10  ;;  %p809_p12 = scmp.lt.s32.totalorder %s803_s10, %s803_s10 }
  0xf9   :  { %v395_v34 = vrot.slane %v214_v14, %v954_v23 }
  0xfa   :  { %v181_v8 = vpop.xlane.xlu1 %180  ;;  %v404_v30 = vrot.slane %v216_v15, %v948_v16  ;;  %v239_v15 = vsub.s32 1, %v940_v6  ;;  %p810_p13 = por %p809_p12, %p808_p11 }
  0xfb   :  { %v175_v9 = vpop.xlane.xlu0 %174  ;;  %v219_v35 = vmul.f32 0.015625, %v181_v8  ;;  %v396_v52 = vsel %vm300_vm3, %v395_v34, %v391_v47  ;;  %v539_v8 = vld [vmem:[#allocation7 + $0x70] sm:$0xff] }
  0xfc   :  { %v217_v18 = vmul.f32 0.015625, %v175_v9  ;;  %v405_v48 = vsel %vm286_vm1, %v404_v30, %v400_v39  ;;  %v444_v61 = vsel %vm443_vm8, %v396_v52, %v442_v59  ;;  %v540_v9 = vld [vmem:[#allocation7 + $0x78] sm:$0xff]  ;;  %v240_v4 = vrot.slane %v231_v11, %v239_v15  ;;  %p811_p0 = pnand %p810_p13, %p804_p10 }
  0xfd   :  { %v419_v53 = vrot.slane %v219_v35, %v943_v12  ;;  %v726_v10 = vpack.c.bf16 %v540_v9, %v539_v8 }
  0xfe   :  { %v178_v13 = vpop.xlane.xlu1 %177  ;;  %v409_v36 = vrot.slane %v217_v18, %v951_v19 }
  0xff   :  { %v184_v28 = vpop.xlane.xlu0 %183  ;;  %v218_v31 = vmul.f32 0.015625, %v178_v13 }
 0x100   :  { %v220_v32 = vmul.f32 0.015625, %v184_v28  ;;  %v410_v54 = vsel %vm293_vm2, %v409_v36, %v405_v48 }
 0x101   :  { %v414_v40 = vrot.slane %v218_v31, %v954_v23 }
 0x102   :  { %v423_v44 = vrot.slane %v220_v32, %v948_v16  ;;  %v190_v46 = vpop.xlane.xlu1 %189 }
 0x103   :  { %v187_v45 = vpop.xlane.xlu0 %186  ;;  %v222_v50 = vmul.f32 0.015625, %v190_v46  ;;  %v415_v16 = vsel %vm300_vm3, %v414_v40, %v410_v54 }
 0x104   :  { %v221_v49 = vmul.f32 0.015625, %v187_v45  ;;  %v424_v60 = vsel %vm286_vm1, %v423_v44, %v419_v53  ;;  %v446_v63 = vsel %vm445_vm9, %v415_v16, %v444_v61 }
 0x105   :  { %v433_v57 = vrot.slane %v222_v50, %v954_v23  ;;  %v555_v23 = vld [vmem:[#allocation7 + $0xf0] sm:$0xff] }
 0x106   :  { %v428_v56 = vrot.slane %v221_v49, %v951_v19  ;;  %v538_v19 = vld [vmem:[#allocation7 + $0x68] sm:$0xff]  ;;  %v724_v5 = vpack.c.bf16 %v556_v62, %v555_v23 }
 0x107   :  { %v722_v2 = vpack.c.bf16 %v538_v19, %v537_v1 }
 0x108   :  { %v429_v58 = vsel %vm293_vm2, %v428_v56, %v424_v60 }
 0x109   :  { %v434_v12 = vsel %vm300_vm3, %v433_v57, %v429_v58  ;;  %723 = vmatpush3.bf16.msra.mxu1 %v722_v2 }
 0x10a   :  { %v448_v0 = vsel %vm447_vm10, %v434_v12, %v446_v63  ;;  %725 = vmatprep.subr.bf16.mxu1 %v724_v5 }
 0x10b   :  { %651 = vmatmul.mubr.msk.f32.vlgmr.msra.gmra.mrb[0].mxu0 %vm449_vm11, %v448_v0 }
 0x10d   :  { %727 = vmatpush3.bf16.msra.mxu1 %v726_v10 }
 0x1de   :  { %v518_v14 = vpop.f32.mrb[0].mxu0 }
 0x1df   :  { %v519_v18 = vadd.f32 %v518_v14, %v236_v17  ;;  %v520_v7 = vpop.f32.mrb[1].mxu0 }
 0x1e0   :  { %v521_v20 = vadd.f32 %v520_v7, %v240_v4 }
 0x1e1   :  { %v523_v22 = vmax.f32 %v519_v18, 0.0 }
 0x1e2   :  { %v524_v21 = vmax.f32 %v521_v20, 0.0 }
 0x1e4   :  { %628 = vmatprep.mubr.f32.mxu1 %v524_v21 }
 0x1e5   :  { %629 = vmatmul.mubr.f32.vlgmr.msra.gmra.mrb[0].mxu1 %v523_v22 }
 0x2b8   :  { %v685_v24 = vpop.f32.mrb[0].mxu1 }
 0x2b9   :  { %v686_v26 = vpop.f32.mrb[1].mxu1 }
 0x2ba   :  { %v687_v27 = vadd.f32 %v686_v26, %v685_v24 }
 0x2bc   :  { %v631_v6 = vadd.f32 %v687_v27, %v652_v25 }
 0x2be   :  { %634 = vst [vmem:[#allocation8] sm:$0xff] %v631_v6 }
 0x2bf   :  { %814 = shalt.err (!%p811_p0)
}
 0x2c0   :  { %s815_s13 = scalar_lea.hbm %s1045_s5, 128 }
 0x2c1   :  { %p816_p1 = scmp.ne.s32.totalorder %s1045_s5, %s815_s13  ;;  %p819_p2 = scmp.lt.u32.totalorder %s815_s13, %s1045_s5 }
 0x2c3   :  { %p821_p3 = pnand %p819_p2, %p816_p1 }
 0x2c5   :  { %824 = shalt.err (!%p821_p3)
}
 0x2c6   :  { %644 = dma.vmem_to_hbm [thread:$0]  %s642_s2, 128, %s1045_s5, [#allocation4]  }
 0x2c7   :  { %829 = dma.done.wait [#allocation4], 128  }
 0x2c8   :  { %830 = vsyncadd [#allocation4], 4294967168 }
 0x2c9   :  { %648 = vsyncpa [#allocation3], 1 }
 0x2ca   :  { %649 = vsyncpa [#allocation6], 1 }
 0x2cb   :  { %650 = vsyncpa [#allocation4], 1 }

</bundles_post_ra>
